<compile_context>
chip_gen: v7x
topology: tpu7x:2x2x1
jax: 0.10.0
libtpu: 0.0.40
codegen_flags: <defaults>
</compile_context>

<pallas_src>
from functools import partial

import jax
import jax.numpy as jnp
from jax.experimental import pallas as pl
from jax.experimental.pallas import tpu as pltpu


def channel_attention_kernel(x_ref, w1_ref, w2_ref, o_ref,
                             sum_ref, max_ref, *, s_total, ts, needs_mask):
    k = pl.program_id(1)

    @pl.when(k == 0)
    def _():
        sum_ref[...] = jnp.zeros_like(sum_ref)
        max_ref[...] = jnp.full_like(max_ref, -jnp.inf)

    # x block: (TN, C, tS) in the input's native dtype; reduce over lanes (S).
    x = x_ref[...]
    if needs_mask:
        # Partial boundary block: lanes whose global spatial position is
        # >= S hold undefined data and must contribute 0 to the sum and
        # -inf to the max.
        lane = jax.lax.broadcasted_iota(jnp.int32, x.shape, 2)
        valid = (k * ts + lane) < s_total
        x_sum = jnp.where(valid, x, jnp.zeros_like(x))
        x_max = jnp.where(valid, x, jnp.full_like(x, -jnp.inf))
    else:
        x_sum = x
        x_max = x

    sum_ref[...] += jnp.sum(x_sum, axis=2, dtype=jnp.float32)            # (TN, C)
    max_ref[...] = jnp.maximum(max_ref[...],
                               jnp.max(x_max, axis=2).astype(jnp.float32))

    @pl.when(k == pl.num_programs(1) - 1)
    def _():
        tn, c = sum_ref.shape
        avg = sum_ref[...] * (1.0 / s_total)                              # (TN, C)
        mx = max_ref[...]                                                 # (TN, C)

        # Fuse the two sharedMLP passes: one (2*TN, C) matmul chain on the MXU.
        pooled = jnp.concatenate([avg, mx], axis=0)                       # (2TN, C)
        w1 = w1_ref[...].astype(jnp.float32)                              # (hid, C)
        w2 = w2_ref[...].astype(jnp.float32)                              # (C, hid)

        h = jax.lax.dot_general(pooled, w1, (((1,), (1,)), ((), ())),
                                preferred_element_type=jnp.float32)       # (2TN, hid)
        h = jnp.maximum(h, 0.0)
        y = jax.lax.dot_general(h, w2, (((1,), (1,)), ((), ())),
                                preferred_element_type=jnp.float32)       # (2TN, C)

        out = jax.nn.sigmoid(y[:tn] + y[tn:])                             # (TN, C)
        o_ref[...] = out.reshape(tn, 1, c).astype(o_ref.dtype)


def _choose_tn(n):
    # Keep the parallel grid axis >= 2 steps whenever N >= 2 so both v7x
    # TensorCores get work (no effect on single-TC v5e/v6e).  tS, not TN,
    # drives DMA burst length, so TN stays modest.
    for d in (8, 4, 2, 1):
        if d <= n and n % d == 0 and n // d >= 2:
            return d
    # TODO(synk): for N == 1, add a leading size-2 "parallel" axis splitting S
    # per core with a small partial-combine so v7x's second core isn't idle.
    return 1


def _choose_ts(s, c, tn, itemsize, x_budget_bytes):
    """Largest lane tile — a multiple of 128 (or the full S when S <= 128) —
    whose double-buffered footprint 2*TN*C*tS*itemsize fits x_budget_bytes.
    The tile never exceeds S; non-divisible S gives a masked boundary block."""
    if s <= 128:
        return s                                   # whole spatial extent, one block
    max_ts = (s // 128) * 128                      # keep the block within the array
    fit = (x_budget_bytes // (2 * tn * c * itemsize) // 128) * 128
    return max(min(max_ts, fit), 128)


def channel_attention(x_nchw, w1, w2, *, ts=None,
                      vmem_budget_bytes=40 * 1024 * 1024):
    """x_nchw: (N, C, H, W); w1: (C//r, C); w2: (C, C//r).  Returns (N, C, 1, 1)."""
    N, C, H, W = x_nchw.shape
    S = H * W
    hidden = w1.shape[0]

    # Free reshape (no transpose): channel axis stays second, spatial flattened.
    x = x_nchw.reshape(N, C, S)
    itemsize = jnp.dtype(x.dtype).itemsize

    TN = _choose_tn(N)
    assert N % TN == 0, (N, TN)

    # VMEM resident regardless of tS: double-buffered weights (constant
    # index_map, but the pipeline still allocates 2 buffers each), the two
    # (TN, C) f32 scratches and the double-buffered output block.
    fixed_bytes = (
        2 * (w1.size * jnp.dtype(w1.dtype).itemsize
             + w2.size * jnp.dtype(w2.dtype).itemsize)
        + 2 * TN * C * 4
        + 2 * TN * C * itemsize)

    if ts is None:
        x_budget = max(vmem_budget_bytes - fixed_bytes, 2 * 1024 * 1024)
        ts = _choose_ts(S, C, TN, itemsize, x_budget)
    assert ts == S or ts % 128 == 0, (S, ts)

    grid_k = pl.cdiv(S, ts)
    needs_mask = (grid_k * ts != S)

    # Explicit scoped-VMEM limit sized from the actual footprint (+ headroom).
    # Defaults are only 16 MiB (v5e) / 32 MiB (v6e, v7x) and would otherwise
    # gate the tile size chosen above.
    x_bytes = 2 * TN * C * ts * itemsize
    vmem_limit = int(max(fixed_bytes + x_bytes + (4 << 20), 16 << 20))

    kernel = partial(channel_attention_kernel,
                     s_total=S, ts=ts, needs_mask=needs_mask)

    out = pl.pallas_call(
        kernel,
        out_shape=jax.ShapeDtypeStruct((N, 1, C), x_nchw.dtype),
        grid_spec=pltpu.PrefetchScalarGridSpec(
            num_scalar_prefetch=0,
            grid=(N // TN, grid_k),                            # reduction axis last
            in_specs=[
                pl.BlockSpec((TN, C, ts), lambda n, k: (n, 0, k)),
                pl.BlockSpec((hidden, C), lambda n, k: (0, 0)),    # pinned in VMEM
                pl.BlockSpec((C, hidden), lambda n, k: (0, 0)),    # pinned in VMEM
            ],
            out_specs=pl.BlockSpec((TN, 1, C), lambda n, k: (n, 0, 0)),
            scratch_shapes=[
                pltpu.VMEM((TN, C), jnp.float32),   # running sum
                pltpu.VMEM((TN, C), jnp.float32),   # running max
            ],
        ),
        compiler_params=pltpu.CompilerParams(
            dimension_semantics=("parallel", "arbitrary"),
            vmem_limit_bytes=vmem_limit),
    )(x, w1, w2)

    return out.reshape(N, C, 1, 1)


def channel_attention_ref(x_nchw, w1, w2):
    """Pure-JAX reference matching the PyTorch forward."""
    xf = x_nchw.astype(jnp.float32)
    avg = jnp.mean(xf, axis=(2, 3))          # (N, C)
    mx = jnp.max(xf, axis=(2, 3))            # (N, C)

    def mlp(v):
        h = jnp.maximum(v @ w1.astype(jnp.float32).T, 0.0)
        return h @ w2.astype(jnp.float32).T

    out = jax.nn.sigmoid(mlp(avg) + mlp(mx))
    return out.astype(x_nchw.dtype).reshape(*out.shape, 1, 1)


if __name__ == "__main__":
    N, C, H, W = 2, 64, 16, 16
    ratio = 16
    hidden = C // ratio

    key = jax.random.PRNGKey(0)
    kx, kw1, kw2, kx2 = jax.random.split(key, 4)

    x = jax.random.normal(kx, (N, C, H, W), dtype=jnp.float32)
    # Conv2d 1x1 (no bias) weights, squeezed to 2-D: (out_ch, in_ch)
    w1 = jax.random.normal(kw1, (hidden, C), dtype=jnp.float32) * 0.1
    w2 = jax.random.normal(kw2, (C, hidden), dtype=jnp.float32) * 0.1

    # 1) Default tiling (S=256 -> one 128-aligned block per batch tile, no mask;
    #    parallel axis has 2 steps so both v7x cores get work).
    y_ref = channel_attention_ref(x, w1, w2)
    y = jax.block_until_ready(channel_attention(x, w1, w2))
    assert y.shape == (N, C, 1, 1), y.shape
    assert jnp.allclose(y, y_ref, atol=1e-5, rtol=1e-5), "mismatch vs reference"

    # 2) Forced streamed multi-step reduction (tS=128 -> 2 k-steps).
    y2 = jax.block_until_ready(channel_attention(x, w1, w2, ts=128))
    assert jnp.allclose(y2, y_ref, atol=1e-5, rtol=1e-5), "mismatch (tiled S)"

    # 3) S not a multiple of 128 (H=W=12 -> S=144): 128-wide tiles with a
    #    masked partial boundary block.
    x2 = jax.random.normal(kx2, (N, C, 12, 12), dtype=jnp.float32)
    y3_ref = channel_attention_ref(x2, w1, w2)
    y3 = jax.block_until_ready(channel_attention(x2, w1, w2))
    assert jnp.allclose(y3, y3_ref, atol=1e-5, rtol=1e-5), "mismatch (masked tail)"

    # 4) Same shape, explicit full-extent spatial block (tS == S, no mask).
    y4 = jax.block_until_ready(channel_attention(x2, w1, w2, ts=144))
    assert jnp.allclose(y4, y3_ref, atol=1e-5, rtol=1e-5), "mismatch (full-S block)"

    print("KERNEL_OK")
</pallas_src>

<mosaic_0001>
module attributes {stable_mosaic.version = 11 : i64} {
  func.func @channel_attention_kernel(%arg0: i32, %arg1: i32, %arg2: memref<1x64x256xf32, #tpu.memory_space<vmem>>, %arg3: memref<4x64xf32, #tpu.memory_space<vmem>>, %arg4: memref<64x4xf32, #tpu.memory_space<vmem>>, %arg5: memref<1x1x64xf32, #tpu.memory_space<vmem>>, %arg6: memref<1x64xf32, #tpu.memory_space<vmem>>, %arg7: memref<1x64xf32, #tpu.memory_space<vmem>>) attributes {dimension_semantics = [#tpu.dimension_semantics<parallel>, #tpu.dimension_semantics<arbitrary>], iteration_bounds = array<i64: 2, 1>, scalar_prefetch = 0 : i64, scratch_operands = 2 : i64, tpu.core_type = #tpu.core_type<tc>, window_params = [{transform_indices = @transform_0, window_bounds = array<i64: 1, 64, 256>}, {pipeline_mode = #tpu.pipeline_mode<synchronous>, transform_indices = @transform_1, window_bounds = array<i64: 4, 64>}, {pipeline_mode = #tpu.pipeline_mode<synchronous>, transform_indices = @transform_2, window_bounds = array<i64: 64, 4>}, {transform_indices = @transform_3, window_bounds = array<i64: 1, 1, 64>}]} {
    %c0_i32 = arith.constant 0 : i32
    %0 = arith.cmpi eq, %arg1, %c0_i32 : i32
    %1 = arith.extui %0 : i1 to i32
    %c0_i32_0 = arith.constant 0 : i32
    %2 = arith.cmpi ne, %1, %c0_i32_0 : i32
    scf.if %2 {
      %cst_14 = arith.constant 0.000000e+00 : f32
      %15 = vector.broadcast %cst_14 : f32 to vector<1x64xf32>
      %c0_15 = arith.constant 0 : index
      %c0_16 = arith.constant 0 : index
      %16 = vector.load %arg6[%c0_15, %c0_16] : memref<1x64xf32, #tpu.memory_space<vmem>>, vector<1x64xf32>
      tpu.vector_store %arg6[%c0_15, %c0_16], %15 {strides = array<i32>} : memref<1x64xf32, #tpu.memory_space<vmem>>, vector<1x64xf32>,
      %cst_17 = arith.constant 0xFF800000 : f32
      %17 = vector.broadcast %cst_17 : f32 to vector<1x64xf32>
      %c0_18 = arith.constant 0 : index
      %c0_19 = arith.constant 0 : index
      %18 = vector.load %arg7[%c0_18, %c0_19] : memref<1x64xf32, #tpu.memory_space<vmem>>, vector<1x64xf32>
      tpu.vector_store %arg7[%c0_18, %c0_19], %17 {strides = array<i32>} : memref<1x64xf32, #tpu.memory_space<vmem>>, vector<1x64xf32>,
    } else {
    }
    %c0 = arith.constant 0 : index
    %c0_1 = arith.constant 0 : index
    %c0_2 = arith.constant 0 : index
    %3 = vector.load %arg2[%c0, %c0_1, %c0_2] : memref<1x64x256xf32, #tpu.memory_space<vmem>>, vector<1x64x256xf32>
    %c0_3 = arith.constant 0 : index
    %c0_4 = arith.constant 0 : index
    %4 = vector.load %arg6[%c0_3, %c0_4] : memref<1x64xf32, #tpu.memory_space<vmem>>, vector<1x64xf32>
    %cst = arith.constant dense<0.000000e+00> : vector<1x64xf32>
    %5 = vector.multi_reduction <add>, %3, %cst [2] : vector<1x64x256xf32> to vector<1x64xf32>
    %6 = arith.addf %4, %5 : vector<1x64xf32>
    %c0_5 = arith.constant 0 : index
    %c0_6 = arith.constant 0 : index
    %7 = vector.load %arg6[%c0_5, %c0_6] : memref<1x64xf32, #tpu.memory_space<vmem>>, vector<1x64xf32>
    tpu.vector_store %arg6[%c0_5, %c0_6], %6 {strides = array<i32>} : memref<1x64xf32, #tpu.memory_space<vmem>>, vector<1x64xf32>,
    %c0_7 = arith.constant 0 : index
    %c0_8 = arith.constant 0 : index
    %8 = vector.load %arg7[%c0_7, %c0_8] : memref<1x64xf32, #tpu.memory_space<vmem>>, vector<1x64xf32>
    %cst_9 = arith.constant dense<0xFF800000> : vector<1x64xf32>
    %9 = vector.multi_reduction <maximumf>, %3, %cst_9 [2] : vector<1x64x256xf32> to vector<1x64xf32>
    %10 = arith.maximumf %8, %9 : vector<1x64xf32>
    %c0_10 = arith.constant 0 : index
    %c0_11 = arith.constant 0 : index
    %11 = vector.load %arg7[%c0_10, %c0_11] : memref<1x64xf32, #tpu.memory_space<vmem>>, vector<1x64xf32>
    tpu.vector_store %arg7[%c0_10, %c0_11], %10 {strides = array<i32>} : memref<1x64xf32, #tpu.memory_space<vmem>>, vector<1x64xf32>,
    %c0_i32_12 = arith.constant 0 : i32
    %12 = arith.cmpi eq, %arg1, %c0_i32_12 : i32
    %13 = arith.extui %12 : i1 to i32
    %c0_i32_13 = arith.constant 0 : i32
    %14 = arith.cmpi ne, %13, %c0_i32_13 : i32
    scf.if %14 {
      %c0_14 = arith.constant 0 : index
      %c0_15 = arith.constant 0 : index
      %15 = vector.load %arg6[%c0_14, %c0_15] : memref<1x64xf32, #tpu.memory_space<vmem>>, vector<1x64xf32>
      %cst_16 = arith.constant 3.906250e-03 : f32
      %16 = vector.broadcast %cst_16 : f32 to vector<1x64xf32>
      %17 = arith.mulf %15, %16 : vector<1x64xf32>
      %c0_17 = arith.constant 0 : index
      %c0_18 = arith.constant 0 : index
      %18 = vector.load %arg7[%c0_17, %c0_18] : memref<1x64xf32, #tpu.memory_space<vmem>>, vector<1x64xf32>
      %19 = tpu.concatenate %17, %18 in 0 : vector<1x64xf32>, vector<1x64xf32> -> vector<2x64xf32>
      %c0_19 = arith.constant 0 : index
      %c0_20 = arith.constant 0 : index
      %20 = vector.load %arg3[%c0_19, %c0_20] : memref<4x64xf32, #tpu.memory_space<vmem>>, vector<4x64xf32>
      %c0_21 = arith.constant 0 : index
      %c0_22 = arith.constant 0 : index
      %21 = vector.load %arg4[%c0_21, %c0_22] : memref<64x4xf32, #tpu.memory_space<vmem>>, vector<64x4xf32>
      %cst_23 = arith.constant dense<0.000000e+00> : vector<2x4xf32>
      %22 = tpu.matmul %19, %20, %cst_23 {dimension_numbers = #tpu.dot_dimension_numbers<[1], [1], [0], [0], [0, 0, 1, 0], [], []>} : vector<2x64xf32>, vector<4x64xf32>, vector<2x4xf32> -> vector<2x4xf32>
      %cst_24 = arith.constant 0.000000e+00 : f32
      %23 = vector.broadcast %cst_24 : f32 to vector<2x4xf32>
      %24 = arith.maximumf %22, %23 : vector<2x4xf32>
      %cst_25 = arith.constant dense<0.000000e+00> : vector<2x64xf32>
      %25 = tpu.matmul %24, %21, %cst_25 {dimension_numbers = #tpu.dot_dimension_numbers<[1], [1], [0], [0], [0, 0, 1, 0], [], []>} : vector<2x4xf32>, vector<64x4xf32>, vector<2x64xf32> -> vector<2x64xf32>
      %26 = vector.extract_strided_slice %25 {offsets = [0, 0], sizes = [1, 64], strides = [1, 1]} : vector<2x64xf32> to vector<1x64xf32>
      %27 = vector.extract_strided_slice %25 {offsets = [1, 0], sizes = [1, 64], strides = [1, 1]} : vector<2x64xf32> to vector<1x64xf32>
      %28 = arith.addf %26, %27 : vector<1x64xf32>
      %29 = arith.negf %28 : vector<1x64xf32>
      %30 = math.exp %29 : vector<1x64xf32>
      %cst_26 = arith.constant 1.000000e+00 : f32
      %31 = vector.broadcast %cst_26 : f32 to vector<1x64xf32>
      %32 = arith.addf %31, %30 : vector<1x64xf32>
      %33 = arith.divf %31, %32 : vector<1x64xf32>
      %34 = vector.shape_cast %33 : vector<1x64xf32> to vector<1x1x64xf32>
      %c0_27 = arith.constant 0 : index
      %c0_28 = arith.constant 0 : index
      %c0_29 = arith.constant 0 : index
      %35 = vector.load %arg5[%c0_27, %c0_28, %c0_29] : memref<1x1x64xf32, #tpu.memory_space<vmem>>, vector<1x1x64xf32>
      tpu.vector_store %arg5[%c0_27, %c0_28, %c0_29], %34 {strides = array<i32>} : memref<1x1x64xf32, #tpu.memory_space<vmem>>, vector<1x1x64xf32>,
    } else {
    }
    return
  }
  func.func @transform_0(%arg0: i32, %arg1: i32) -> (i32, i32, i32) {
    %c0_i32 = arith.constant 0 : i32
    %c0_i32_0 = arith.constant 0 : i32
    return %arg0, %c0_i32, %arg1 : i32, i32, i32
  }
  func.func @transform_1(%arg0: i32, %arg1: i32) -> (i32, i32) {
    %c0_i32 = arith.constant 0 : i32
    %c0_i32_0 = arith.constant 0 : i32
    %c0_i32_1 = arith.constant 0 : i32
    return %c0_i32, %c0_i32_0 : i32, i32
  }
  func.func @transform_2(%arg0: i32, %arg1: i32) -> (i32, i32) {
    %c0_i32 = arith.constant 0 : i32
    %c0_i32_0 = arith.constant 0 : i32
    %c0_i32_1 = arith.constant 0 : i32
    return %c0_i32, %c0_i32_0 : i32, i32
  }
  func.func @transform_3(%arg0: i32, %arg1: i32) -> (i32, i32, i32) {
    %c0_i32 = arith.constant 0 : i32
    %c0_i32_0 = arith.constant 0 : i32
    %c0_i32_1 = arith.constant 0 : i32
    return %arg0, %c0_i32, %c0_i32_0 : i32, i32, i32
  }
}

</mosaic_0001>

<bundles_post_ra>
// kernel: tpu_custom_call.1
= control target key start
LH: loop header
LB: loop body
LE: loop exit
PB: predicated region body
PF: predicated region fallthrough
CT: control target
= control target key end

     0   :  { %8 = vsyncpa [#allocation5], 0  ;;  %s2916_s0 = inlined_call_operand.hbm [shape: f32[2,64,256], index: 0, kind: input, shape index: {}]   ;;  %s2917_s1 = inlined_call_operand.vmem [shape: f32[4,64], index: 1, kind: input, shape index: {}]   ;;  %s2918_s2 = inlined_call_operand.vmem [shape: f32[64,4], index: 2, kind: input, shape index: {}]   ;;  %s2919_s3 = inlined_call_operand.hbm [shape: f32[2,1,64], index: 3, kind: output, shape index: {}]  }
   0x1   :  { %10 = vsyncpa [#allocation5 + $0x1], 0 }
   0x2   :  { %11 = vsyncpa [#allocation6], 0 }
   0x3   :  { %13 = vsyncpa [#allocation6 + $0x1], 0  ;;  %s2364_s12 = smov 0   ;;  %s2366_s13 = smov 0  }
   0x4   :  { %s2368_s14 = smov 0   ;;  %s2370_s15 = smov 0  }
   0x5   :  { %s2372_s16 = smov 0   ;;  %s2374_s17 = smov 0  }
   0x6 LB: > { %s2067_s18 = sadd.s32 4294967295, %s2332_s17   ;;  %s2068_s19 = sadd.s32 4294967294, %s2332_s17   ;;  %s2332_s17 = sphi %s2374_s17, %s19_s17   ;;  %s2328_s16 = sphi %s2372_s16, %s2936_s16   ;;  %s2324_s15 = sphi %s2370_s15, %s2935_s15   ;;  %s2320_s14 = sphi %s2368_s14, %s2934_s14   ;;  %s2316_s13 = sphi %s2366_s13, %s2933_s13   ;;  %s2312_s12 = sphi %s2364_s12, %s2932_s12  }
   0x7   : > { %s31_s20 = sadd.s32 1, %s2328_s16  ;;  %s40_s21 = sadd.s32 1, %s2320_s14 }
   0x8   : > { %p33_p0 = scmp.ge.s32.totalorder %s31_s20, 2  ;;  %p47_p1 = scmp.ne.s32.totalorder %s2320_s14, %s2316_s13 }
   0x9   : > { %p48_p2 = scmp.eq.s32.totalorder %s2332_s17, 0  ;;  %p53_p3 = scmp.ne.s32.totalorder %s2316_s13, %s2312_s12 }
   0xa   : > { %s2938_s20 = smov (%p33_p0, %s31_s20), 0  ;;  %p54_p5 = scmp.eq.s32.totalorder %s2067_s18, 0 }
   0xb   : > { %p2405_p4 = por %p48_p2, %p47_p1  ;;  %s35_s23 = ssub.s32 %s2328_s16, %s2938_s20 }
   0xc   : > { %p119_p6 = scmp.eq.s32.totalorder %s2067_s18, 1  ;;  %p38_p7 = scmp.eq.s32.totalorder %s35_s23, 0 }
   0xd   : > { %p2411_p8 = por %p54_p5, %p53_p3  ;;  %p125_p10 = scmp.eq.s32.totalorder %s2068_s19, 1 }
   0xe   : > { %p2415_p9 = por %p119_p6, %p47_p1  ;;  %p2156_p13 = scmp.lt.s32.totalorder %s2332_s17, 2 }
   0xf   : > { %s2420_s26 = scalar_select %p38_p7, %s2320_s14, %s40_s21  }
  0x10   : > { %s2923_s25 = scalar_select %p2415_p9, 1, 0 }
  0x11   : > { %p2422_p11 = por %p125_p10, %p53_p3  ;;  %s151_s28 = sand.u32 1, %s2320_s14  }
  0x12   : > { %s2071_s29 = sshll.u32 %s151_s28, 7  ;;  %s2092_s30 = sshll.u32 %s2328_s16, 11 }
  0x13   : > { %s2924_s27 = scalar_select %p2422_p11, 1, 0 }
  0x14   : > { %s2433_s6 = scalar_lea.hbm %s2916_s0, %s2092_s30  ;;  %s155_s7 = scalar_lea.vmem [#allocation4], %s2071_s29 }
  0x15   : > { %s164_s8 = sshll.u32 %s155_s7, 4  ;;  %p2439_p0 = pnand %p2156_p13, %p2405_p4  ;;  %s2435_s8 = int_to_ptr.vmem [resolvable:$true] %s164_s8 }
  0x16   : > { %s2444_s10 = scalar_lea.sflag [#allocation5], %s151_s28  ;;  %s2220_s11 = scalar_lea.hbm %s2433_s6, 2048 }
  0x17   : > { %p2221_p2 = scmp.ne.s32.totalorder %s2433_s6, %s2220_s11  ;;  %p2222_p3 = pneg %p2439_p0 }
  0x18   : > { %s2225_s21 = scalar_lea.hbm %s2916_s0, 4096  ;;  %p2226_p4 = scmp.lt.u32.totalorder %s2433_s6, %s2916_s0 }
  0x19   : > { %p2223_p5 = pnand %p2222_p3, %p2221_p2  ;;  %p2227_p7 = scmp.lt.u32.totalorder %s2225_s21, %s2220_s11 }
  0x1a   : > { %p2229_p13 = scmp.lt.u32.totalorder %s2220_s11, %s2433_s6 }
  0x1b   : > { %p2224_p6 = pneg %p2223_p5  ;;  %p2228_p10 = por %p2227_p7, %p2226_p4 }
  0x1d   : > { %p2230_p12 = por %p2229_p13, %p2228_p10 }
  0x1f   : > { %p2231_p1 = pnand %p2230_p12, %p2224_p6 }
  0x21   : > { %2234 = shalt.err (!%p2231_p1)
}
  0x22   : > { %s2235_s28 = scalar_lea.vmem %s2435_s8, 2048  ;;  %s2334_s29 = smov [#allocation4]  }
  0x23   : > { %p2236_p2 = scmp.ne.s32.totalorder %s2435_s8, %s2235_s28  ;;  %s2240_s30 = sshll.u32 %s2334_s29, 4  ;;  %s2241_s30 = int_to_ptr.vmem [resolvable:$false] %s2240_s30 }
  0x24   : > { %s2242_s4 = scalar_lea.vmem %s2241_s30, 4096  ;;  %p2243_p9 = scmp.lt.s32.totalorder %s2435_s8, %s2241_s30 }
  0x25   : > { %p2238_p5 = pnand %p2236_p2, %p2222_p3  ;;  %p2244_p4 = scmp.lt.s32.totalorder %s2242_s4, %s2235_s28 }
  0x27   : > { %p2239_p11 = pneg %p2238_p5  ;;  %p2245_p7 = por %p2244_p4, %p2243_p9 }
  0x29   : > { %p2246_p10 = pnand %p2245_p7, %p2239_p11 }
  0x2b   : > { %2249 = shalt.err (!%p2246_p10)
}
  0x2c   : > { %s2335_s5 = smov 256   ;;  %s2336_s7 = smov 16  }
  0x2d   : > { %2151 = dma.hbm_to_vmem [thread:$0]  (!%p2439_p0), %s2433_s6, 2048, %s2435_s8, %s2444_s10, %s2335_s5, %s2335_s5, %s2336_s7  }
  0x2e   : > { %p172_p12 = scmp.lt.s32.totalorder %s2332_s17, 3  ;;  %p2926_p1 = scmp.ge.s32.totalorder %s2332_s17, 1 }
  0x30   : > { %p173_p3 = pnand %p2926_p1, %p172_p12 }
  0x31   : > { %s2476_s11 = sand.u32 (!%p173_p3), 1, %s2316_s13  }
  0x32   : > { %176 = sbr.rel (%p173_p3) target bundleno = 911 (0x38f), region = 32  ;;  %s2075_s18 = sshll.u32 (!%p173_p3), %s2476_s11, 7 }
  0x33   : > { %s179_s19 = scalar_lea.sflag (!%p173_p3), [#allocation5], %s2476_s11  ;;  %s2480_s21 = scalar_lea.vmem (!%p173_p3), [#allocation4], %s2075_s18 }
  0x39   : > { %2303 = dma.done.wait (%p2411_p8), %s179_s19, 2048  }
  0x3a   : > { %2305 = vsyncadd (%p2411_p8), %s179_s19, 4294965248  ;;  %v212_v0 = vld [vmem:[%s2480_s21] sm:$0xff]  ;;  %v213_v1 = vld [vmem:[%s2480_s21 + $0x8] sm:$0xff]  ;;  %v2337_v30 = vmov 0   ;;  %v261_v33 = vlaneseq  ;;  %v2338_v34 = vmov 1966171168  }
  0x3b   : > { %v216_v2 = vld [vmem:[%s2480_s21 + $0x20] sm:$0xff]  ;;  %v229_v3 = vadd.f32 %v213_v1, %v212_v0  ;;  %v217_v4 = vld [vmem:[%s2480_s21 + $0x28] sm:$0xff]  ;;  %v214_v5 = vld [vmem:[%s2480_s21 + $0x10] sm:$0xff]  ;;  %v1007_v12 = vmax.f32 %v212_v0, %v213_v1  ;;  %2214 = vset.pattern.permute.xlu0 %v2337_v30  ;;  %2215 = vset.pattern.permute.xlu1 %v2337_v30  ;;  %v522_v35 = vunpack.c.l.s4 %v2338_v34  ;;  %vm209_vm0 = vcmask 516096   ;;  %s2089_s8 = sshll.u32 %s2324_s15, 4  ;;  %s203_s9 = scalar_lea.vmem [#allocation7], %s2476_s11 }
  0x3c   : > { %v215_v6 = vld [vmem:[%s2480_s21 + $0x18] sm:$0xff]  ;;  %v235_v7 = vadd.f32 %v217_v4, %v216_v2  ;;  %v218_v8 = vld [vmem:[%s2480_s21 + $0x30] sm:$0xff]  ;;  %v220_v14 = vld [vmem:[%s2480_s21 + $0x40] sm:$0xff]  ;;  %v1013_v17 = vmax.f32 %v216_v2, %v217_v4  ;;  %v2503_v36 = vshrl.u32 %v261_v33, 7  ;;  %vm1790_vm1 = vcmask 523264   ;;  %s1990_s10 = sshll.u32 %s203_s9, 4  ;;  %s2866_s28 = scalar_lea.hbm %s2919_s3, %s2089_s8  ;;  %s2868_s10 = int_to_ptr.vmem [resolvable:$true] %s1990_s10 }
  0x3d   : > { %v219_v9 = vld [vmem:[%s2480_s21 + $0x38] sm:$0xff]  ;;  %230 = vadd.xlane.f32.xlu0 %v229_v3  ;;  %v232_v10 = vadd.f32 %v215_v6, %v214_v5  ;;  %v1010_v13 = vmax.f32 %v214_v5, %v215_v6  ;;  %v221_v15 = vld [vmem:[%s2480_s21 + $0x48] sm:$0xff]  ;;  %v222_v18 = vld [vmem:[%s2480_s21 + $0x50] sm:$0xff]  ;;  %v523_v37 = vunpack.c.0.s8 %v522_v35  ;;  %vm2341_vm2 = vmmov 0   ;;  %s1978_s29 = scalar_lea.sflag [#allocation6], %s2476_s11  ;;  %s2250_s30 = scalar_lea.vmem %s2868_s10, 16 }
  0x3e   : > { %236 = vadd.xlane.f32.xlu1 %v235_v7  ;;  %v238_v11 = vadd.f32 %v219_v9, %v218_v8  ;;  %v241_v16 = vadd.f32 %v221_v15, %v220_v14  ;;  %v223_v19 = vld [vmem:[%s2480_s21 + $0x58] sm:$0xff]  ;;  %v1016_v21 = vmax.f32 %v218_v8, %v219_v9  ;;  %v224_v22 = vld [vmem:[%s2480_s21 + $0x60] sm:$0xff]  ;;  %v225_v23 = vld [vmem:[%s2480_s21 + $0x68] sm:$0xff]  ;;  %v1019_v25 = vmax.f32 %v220_v14, %v221_v15  ;;  %p2251_p8 = scmp.ne.s32.totalorder %s2868_s10, %s2250_s30  ;;  %p2929_p9 = scmp.ne.s32.totalorder %s2923_s25, 0 }
  0x3f   : > { %v244_v20 = vadd.f32 %v223_v19, %v222_v18  ;;  %v247_v24 = vadd.f32 %v225_v23, %v224_v22  ;;  %v226_v26 = vld [vmem:[%s2480_s21 + $0x70] sm:$0xff]  ;;  %v227_v27 = vld [vmem:[%s2480_s21 + $0x78] sm:$0xff]  ;;  %v1022_v29 = vmax.f32 %v222_v18, %v223_v19  ;;  %v1025_v31 = vmax.f32 %v224_v22, %v225_v23  ;;  %s2343_s15 = smov [#allocation7]  }
  0x40   : > { %v250_v28 = vadd.f32 %v227_v27, %v226_v26  ;;  %v1028_v32 = vmax.f32 %v226_v26, %v227_v27  ;;  %v2506_v38 = vsub.s32 0, %v2503_v36  ;;  %v2509_v39 = vsub.s32 1, %v2503_v36  ;;  %p2252_p11 = pnand %p2251_p8, %p2929_p9  ;;  %s2254_s4 = sshll.u32 %s2343_s15, 4  ;;  %s2255_s4 = int_to_ptr.vmem [resolvable:$false] %s2254_s4 }
  0x41   : > { %233 = vadd.xlane.f32.xlu0 %v232_v10  ;;  %v2512_v40 = vsub.s32 2, %v2503_v36  ;;  %v2515_v41 = vsub.s32 3, %v2503_v36  ;;  %v2518_v42 = vsub.s32 4, %v2503_v36  ;;  %v2521_v43 = vsub.s32 5, %v2503_v36  ;;  %s2256_s5 = scalar_lea.vmem %s2255_s4, 32  ;;  %p2257_p6 = scmp.lt.s32.totalorder %s2868_s10, %s2255_s4 }
  0x42   : > { %239 = vadd.xlane.f32.xlu1 %v238_v11  ;;  %v2524_v44 = vsub.s32 6, %v2503_v36  ;;  %v2527_v45 = vsub.s32 7, %v2503_v36  ;;  %v2530_v47 = vsub.s32 %v523_v37, %v2503_v36  ;;  %vm1868_vm3 = vcmask 31744   ;;  %p2253_p0 = pneg %p2252_p11  ;;  %p2258_p13 = scmp.lt.s32.totalorder %s2256_s5, %s2250_s30 }
  0x43   : > { %vm2800_vm4 = vmpackc.low %vm1868_vm3, %vm1868_vm3  ;;  %vm944_vm5 = vcmask 130112   ;;  %vm951_vm6 = vcmask 195712   ;;  %vm958_vm7 = vcmask 261312   ;;  %vm965_vm8 = vcmask 326912  }
  0x44   : > { %vm972_vm9 = vcmask 392512   ;;  %vm979_vm10 = vcmask 458112   ;;  %vm986_vm11 = vcmask 523712   ;;  %vm1779_vm12 = vcmask 1040384   ;;  %p2259_p2 = por %p2258_p13, %p2257_p6 }
  0x45   : > { %1008 = vmax.xlane.f32.xlu0 %v1007_v12 }
  0x46   : > { %1011 = vmax.xlane.f32.xlu1 %v1010_v13  ;;  %p2260_p5 = pnand %p2259_p2, %p2253_p0 }
  0x49   : > { %242 = vadd.xlane.f32.xlu0 %v241_v16 }
  0x4a   : > { %1014 = vmax.xlane.f32.xlu1 %v1013_v17 }
  0x4d   : > { %245 = vadd.xlane.f32.xlu0 %v244_v20 }
  0x4e   : > { %1017 = vmax.xlane.f32.xlu1 %v1016_v21 }
  0x51   : > { %248 = vadd.xlane.f32.xlu0 %v247_v24 }
  0x52   : > { %1020 = vmax.xlane.f32.xlu1 %v1019_v25 }
  0x55   : > { %251 = vadd.xlane.f32.xlu0 %v250_v28 }
  0x56   : > { %1023 = vmax.xlane.f32.xlu1 %v1022_v29 }
  0x59   : > { %1026 = vmax.xlane.f32.xlu0 %v1025_v31 }
  0x5a   : > { %1029 = vmax.xlane.f32.xlu1 %v1028_v32 }
  0xca   : > { %v231_v46 = vpop.xlane.xlu0 %230 }
  0xcb   : > { %v237_v48 = vpop.xlane.xlu1 %236  ;;  %v264_v49 = vrot.slane %v231_v46, %v2506_v38  ;;  %v268_v50 = vrot.slane %v231_v46, %v2509_v39  ;;  %v272_v51 = vrot.slane %v231_v46, %v2512_v40  ;;  %v276_v52 = vrot.slane %v231_v46, %v2515_v41 }
  0xcc   : > { %v280_v53 = vrot.slane %v231_v46, %v2518_v42  ;;  %v284_v54 = vrot.slane %v231_v46, %v2521_v43  ;;  %v288_v55 = vrot.slane %v231_v46, %v2524_v44  ;;  %v292_v56 = vrot.slane %v231_v46, %v2527_v45 }
  0xcd   : > { %v517_v57 = vcombine.low %v264_v49, %v268_v50  ;;  %v518_v58 = vcombine.low %v272_v51, %v276_v52  ;;  %v328_v59 = vrot.slane %v237_v48, %v2506_v38  ;;  %v332_v60 = vrot.slane %v237_v48, %v2509_v39 }
  0xce   : > { %v234_v61 = vpop.xlane.xlu0 %233  ;;  %v519_v62 = vcombine.low %v280_v53, %v284_v54  ;;  %v520_v63 = vcombine.low %v288_v55, %v292_v56  ;;  %v336_v0 = vrot.slane %v237_v48, %v2512_v40  ;;  %v340_v1 = vrot.slane %v237_v48, %v2515_v41 }
  0xcf   : > { %v2544_v2 = vpop.xlane.xlu1 %239  ;;  %v527_v3 = vrot.slane %v517_v57, %v2530_v47  ;;  %v534_v4 = vrot.slane %v518_v58, %v2530_v47  ;;  %v296_v5 = vrot.slane %v234_v61, %v2506_v38  ;;  %v300_v6 = vrot.slane %v234_v61, %v2509_v39 }
  0xd0   : > { %v541_v7 = vrot.slane %v519_v62, %v2530_v47  ;;  %v548_v8 = vrot.slane %v520_v63, %v2530_v47  ;;  %v304_v9 = vrot.slane %v234_v61, %v2512_v40  ;;  %v308_v10 = vrot.slane %v234_v61, %v2515_v41 }
  0xd1   : > { %v549_v11 = vcombine.low %v527_v3, %v534_v4  ;;  %v312_v12 = vrot.slane %v234_v61, %v2518_v42  ;;  %v316_v13 = vrot.slane %v234_v61, %v2521_v43  ;;  %v320_v14 = vrot.slane %v234_v61, %v2524_v44 }
  0xd2   : > { %v550_v15 = vcombine.low %v541_v7, %v548_v8  ;;  %v324_v16 = vrot.slane %v234_v61, %v2527_v45  ;;  %v566_v17 = vcombine.low %v296_v5, %v300_v6  ;;  %v567_v18 = vcombine.low %v304_v9, %v308_v10 }
  0xd3   : > { %v2558_v19 = vpop.xlane.xlu1 %1011  ;;  %v557_v20 = vrot.slane %v549_v11, %v2530_v47  ;;  %v568_v21 = vcombine.low %v312_v12, %v316_v13  ;;  %v344_v22 = vrot.slane %v237_v48, %v2518_v42  ;;  %v348_v23 = vrot.slane %v237_v48, %v2521_v43 }
  0xd4   : > { %v564_v24 = vrot.slane %v550_v15, %v2530_v47  ;;  %v569_v25 = vcombine.low %v320_v14, %v324_v16  ;;  %v576_v26 = vrot.slane %v566_v17, %v2530_v47  ;;  %v583_v27 = vrot.slane %v567_v18, %v2530_v47 }
  0xd5   : > { %v590_v28 = vrot.slane %v568_v21, %v2530_v47  ;;  %v352_v29 = vrot.slane %v237_v48, %v2524_v44  ;;  %v356_v30 = vrot.slane %v237_v48, %v2527_v45  ;;  %v615_v31 = vcombine.low %v328_v59, %v332_v60  ;;  %v1009_v60 = vpop.xlane.xlu0 %1008 }
  0xd6   : > { %v565_v32 = vcombine.low %v557_v20, %v564_v24  ;;  %v597_v34 = vrot.slane %v569_v25, %v2530_v47  ;;  %v598_v35 = vcombine.low %v576_v26, %v583_v27  ;;  %v616_v37 = vcombine.low %v336_v0, %v340_v1 }
  0xd7   : > { %v617_v46 = vcombine.low %v344_v22, %v348_v23  ;;  %v618_v49 = vcombine.low %v352_v29, %v356_v30  ;;  %v625_v50 = vrot.slane %v615_v31, %v2530_v47  ;;  %v360_v51 = vrot.slane %v2544_v2, %v2506_v38  ;;  %v2573_v52 = vpop.xlane.xlu1 %1014 }
  0xd8   : > { %910 = vperm.xlu0 %2214, %v565_v32   ;;  %v599_v53 = vcombine.low %v590_v28, %v597_v34  ;;  %v606_v54 = vrot.slane %v598_v35, %v2530_v47  ;;  %v632_v48 = vrot.slane %v616_v37, %v2530_v47  ;;  %v364_v55 = vrot.slane %v2544_v2, %v2509_v39 }
  0xd9   : > { %v639_v56 = vrot.slane %v617_v46, %v2530_v47  ;;  %v646_v57 = vrot.slane %v618_v49, %v2530_v47  ;;  %v368_v58 = vrot.slane %v2544_v2, %v2512_v40  ;;  %v372_v59 = vrot.slane %v2544_v2, %v2515_v41 }
  0xda   : > { %v613_v61 = vrot.slane %v599_v53, %v2530_v47  ;;  %v647_v62 = vcombine.low %v625_v50, %v632_v48  ;;  %v376_v63 = vrot.slane %v2544_v2, %v2518_v42  ;;  %v380_v0 = vrot.slane %v2544_v2, %v2521_v43 }
  0xdb   : > { %v648_v1 = vcombine.low %v639_v56, %v646_v57  ;;  %v384_v3 = vrot.slane %v2544_v2, %v2524_v44  ;;  %v388_v4 = vrot.slane %v2544_v2, %v2527_v45  ;;  %v664_v5 = vcombine.low %v360_v51, %v364_v55  ;;  %v1018_v14 = vpop.xlane.xlu1 %1017 }
  0xdc   : > { %v614_v6 = vcombine.low %v606_v54, %v613_v61  ;;  %v655_v7 = vrot.slane %v647_v62, %v2530_v47  ;;  %v665_v8 = vcombine.low %v368_v58, %v372_v59  ;;  %v666_v9 = vcombine.low %v376_v63, %v380_v0 }
  0xdd   : > { %v662_v10 = vrot.slane %v648_v1, %v2530_v47  ;;  %v667_v11 = vcombine.low %v384_v3, %v388_v4  ;;  %v674_v12 = vrot.slane %v664_v5, %v2530_v47  ;;  %v1042_v13 = vrot.slane %v1009_v60, %v2506_v38 }
  0xde   : > { %913 = vperm.xlu1 %2215, %v614_v6   ;;  %v681_v15 = vrot.slane %v665_v8, %v2530_v47  ;;  %v688_v16 = vrot.slane %v666_v9, %v2530_v47  ;;  %v1046_v2 = vrot.slane %v1009_v60, %v2509_v39  ;;  %v1050_v17 = vrot.slane %v1009_v60, %v2512_v40 }
  0xdf   : > { %v663_v18 = vcombine.low %v655_v7, %v662_v10  ;;  %v695_v20 = vrot.slane %v667_v11, %v2530_v47  ;;  %v1054_v21 = vrot.slane %v1009_v60, %v2515_v41  ;;  %v1058_v22 = vrot.slane %v1009_v60, %v2518_v42  ;;  %v1021_v8 = vpop.xlane.xlu1 %1020 }
  0xe0   : > { %v696_v23 = vcombine.low %v674_v12, %v681_v15  ;;  %v1062_v24 = vrot.slane %v1009_v60, %v2521_v43  ;;  %v1066_v25 = vrot.slane %v1009_v60, %v2524_v44  ;;  %v1070_v26 = vrot.slane %v1009_v60, %v2527_v45 }
  0xe1   : > { %v697_v27 = vcombine.low %v688_v16, %v695_v20  ;;  %v1295_v28 = vcombine.low %v1042_v13, %v1046_v2  ;;  %v1296_v29 = vcombine.low %v1050_v17, %v1054_v21  ;;  %v1138_v30 = vrot.slane %v1018_v14, %v2506_v38 }
  0xe2   : > { %916 = vperm.xlu1 %2215, %v663_v18   ;;  %v704_v31 = vrot.slane %v696_v23, %v2530_v47  ;;  %v1297_v32 = vcombine.low %v1058_v22, %v1062_v24  ;;  %v1298_v34 = vcombine.low %v1066_v25, %v1070_v26  ;;  %v1142_v35 = vrot.slane %v1018_v14, %v2509_v39 }
  0xe3   : > { %v711_v37 = vrot.slane %v697_v27, %v2530_v47  ;;  %v1305_v46 = vrot.slane %v1295_v28, %v2530_v47  ;;  %v1312_v49 = vrot.slane %v1296_v29, %v2530_v47  ;;  %v1146_v50 = vrot.slane %v1018_v14, %v2512_v40 }
  0xe4   : > { %v1319_v51 = vrot.slane %v1297_v32, %v2530_v47  ;;  %v1326_v53 = vrot.slane %v1298_v34, %v2530_v47  ;;  %v1150_v54 = vrot.slane %v1018_v14, %v2515_v41  ;;  %v1154_v48 = vrot.slane %v1018_v14, %v2518_v42  ;;  %v243_v32 = vpop.xlane.xlu0 %242 }
  0xe5   : > { %v712_v55 = vcombine.low %v704_v31, %v711_v37  ;;  %v1327_v56 = vcombine.low %v1305_v46, %v1312_v49  ;;  %v1158_v57 = vrot.slane %v1018_v14, %v2521_v43  ;;  %v1162_v58 = vrot.slane %v1018_v14, %v2524_v44 }
  0xe6   : > { %v1328_v59 = vcombine.low %v1319_v51, %v1326_v53  ;;  %v1166_v60 = vrot.slane %v1018_v14, %v2527_v45  ;;  %v1442_v61 = vcombine.low %v1138_v30, %v1142_v35  ;;  %v1443_v62 = vcombine.low %v1146_v50, %v1150_v54 }
  0xe7   : > { %919 = vperm.xlu1 %2215, %v712_v55   ;;  %v1335_v63 = vrot.slane %v1327_v56, %v2530_v47  ;;  %v1444_v0 = vcombine.low %v1154_v48, %v1158_v57  ;;  %v1074_v1 = vrot.slane %v2558_v19, %v2506_v38  ;;  %v1078_v3 = vrot.slane %v2558_v19, %v2509_v39 }
  0xe8   : > { %v1342_v4 = vrot.slane %v1328_v59, %v2530_v47  ;;  %v1445_v5 = vcombine.low %v1162_v58, %v1166_v60  ;;  %v1452_v6 = vrot.slane %v1442_v61, %v2530_v47  ;;  %v1459_v7 = vrot.slane %v1443_v62, %v2530_v47 }
  0xe9   : > { %v1466_v9 = vrot.slane %v1444_v0, %v2530_v47  ;;  %v1082_v10 = vrot.slane %v2558_v19, %v2512_v40  ;;  %v1086_v11 = vrot.slane %v2558_v19, %v2515_v41  ;;  %v1090_v12 = vrot.slane %v2558_v19, %v2518_v42 }
  0xea   : > { %v1343_v13 = vcombine.low %v1335_v63, %v1342_v4  ;;  %v1473_v14 = vrot.slane %v1445_v5, %v2530_v47  ;;  %v1474_v15 = vcombine.low %v1452_v6, %v1459_v7  ;;  %v1094_v16 = vrot.slane %v2558_v19, %v2521_v43 }
  0xeb   : > { %v1098_v2 = vrot.slane %v2558_v19, %v2524_v44  ;;  %v1102_v17 = vrot.slane %v2558_v19, %v2527_v45  ;;  %v1344_v18 = vcombine.low %v1074_v1, %v1078_v3  ;;  %v1345_v20 = vcombine.low %v1082_v10, %v1086_v11  ;;  %v1024_v1 = vpop.xlane.xlu1 %1023 }
  0xec   : > { %1688 = vperm.xlu1 %2215, %v1343_v13   ;;  %v1475_v21 = vcombine.low %v1466_v9, %v1473_v14  ;;  %v1482_v22 = vrot.slane %v1474_v15, %v2530_v47  ;;  %v1346_v23 = vcombine.low %v1090_v12, %v1094_v16  ;;  %v1170_v24 = vrot.slane %v1021_v8, %v2506_v38 }
  0xed   : > { %v1347_v25 = vcombine.low %v1098_v2, %v1102_v17  ;;  %v1354_v26 = vrot.slane %v1344_v18, %v2530_v47  ;;  %v1361_v27 = vrot.slane %v1345_v20, %v2530_v47  ;;  %v1174_v28 = vrot.slane %v1021_v8, %v2509_v39 }
  0xee   : > { %v1489_v29 = vrot.slane %v1475_v21, %v2530_v47  ;;  %v1368_v19 = vrot.slane %v1346_v23, %v2530_v47  ;;  %v1178_v30 = vrot.slane %v1021_v8, %v2512_v40  ;;  %v1182_v31 = vrot.slane %v1021_v8, %v2515_v41 }
  0xef   : > { %v1375_v34 = vrot.slane %v1347_v25, %v2530_v47  ;;  %v1376_v35 = vcombine.low %v1354_v26, %v1361_v27  ;;  %v1186_v37 = vrot.slane %v1021_v8, %v2518_v42  ;;  %v1190_v46 = vrot.slane %v1021_v8, %v2521_v43 }
  0xf0   : > { %v1490_v49 = vcombine.low %v1482_v22, %v1489_v29  ;;  %v1194_v50 = vrot.slane %v1021_v8, %v2524_v44  ;;  %v1198_v51 = vrot.slane %v1021_v8, %v2527_v45  ;;  %v1491_v53 = vcombine.low %v1170_v24, %v1174_v28 }
  0xf1   : > { %v1377_v54 = vcombine.low %v1368_v19, %v1375_v34  ;;  %v1384_v48 = vrot.slane %v1376_v35, %v2530_v47  ;;  %v1492_v55 = vcombine.low %v1178_v30, %v1182_v31  ;;  %v1493_v56 = vcombine.low %v1186_v37, %v1190_v46 }
  0xf2   : > { %1697 = vperm.xlu0 %2214, %v1490_v49   ;;  %v1494_v57 = vcombine.low %v1194_v50, %v1198_v51  ;;  %v1501_v58 = vrot.slane %v1491_v53, %v2530_v47  ;;  %v392_v59 = vrot.slane %v243_v32, %v2506_v38  ;;  %v396_v60 = vrot.slane %v243_v32, %v2509_v39 }
  0xf3   : > { %v1391_v61 = vrot.slane %v1377_v54, %v2530_v47  ;;  %v1508_v62 = vrot.slane %v1492_v55, %v2530_v47  ;;  %v1515_v63 = vrot.slane %v1493_v56, %v2530_v47  ;;  %v400_v0 = vrot.slane %v243_v32, %v2512_v40 }
  0xf4   : > { %v1522_v3 = vrot.slane %v1494_v57, %v2530_v47  ;;  %v404_v4 = vrot.slane %v243_v32, %v2515_v41  ;;  %v408_v5 = vrot.slane %v243_v32, %v2518_v42  ;;  %v412_v6 = vrot.slane %v243_v32, %v2521_v43 }
  0xf5   : > { %v1392_v7 = vcombine.low %v1384_v48, %v1391_v61  ;;  %v1523_v8 = vcombine.low %v1501_v58, %v1508_v62  ;;  %v416_v9 = vrot.slane %v243_v32, %v2524_v44  ;;  %v420_v10 = vrot.slane %v243_v32, %v2527_v45  ;;  %v1030_v48 = vpop.xlane.xlu1 %1029 }
  0xf6   : > { %v1524_v11 = vcombine.low %v1515_v63, %v1522_v3  ;;  %v713_v12 = vcombine.low %v392_v59, %v396_v60  ;;  %v714_v13 = vcombine.low %v400_v0, %v404_v4  ;;  %v715_v14 = vcombine.low %v408_v5, %v412_v6  ;;  %v246_v4 = vpop.xlane.xlu0 %245 }
  0xf7   : > { %1691 = vperm.xlu1 %2215, %v1392_v7   ;;  %v1531_v15 = vrot.slane %v1523_v8, %v2530_v47  ;;  %v716_v16 = vcombine.low %v416_v9, %v420_v10  ;;  %v1202_v2 = vrot.slane %v1024_v1, %v2506_v38  ;;  %v1206_v17 = vrot.slane %v1024_v1, %v2509_v39 }
  0xf8   : > { %v1538_v18 = vrot.slane %v1524_v11, %v2530_v47  ;;  %v723_v20 = vrot.slane %v713_v12, %v2530_v47  ;;  %v730_v21 = vrot.slane %v714_v13, %v2530_v47  ;;  %v737_v22 = vrot.slane %v715_v14, %v2530_v47 }
  0xf9   : > { %v744_v23 = vrot.slane %v716_v16, %v2530_v47  ;;  %v1210_v24 = vrot.slane %v1024_v1, %v2512_v40  ;;  %v1214_v25 = vrot.slane %v1024_v1, %v2515_v41  ;;  %v1218_v26 = vrot.slane %v1024_v1, %v2518_v42 }
  0xfa   : > { %v1539_v27 = vcombine.low %v1531_v15, %v1538_v18  ;;  %v745_v28 = vcombine.low %v723_v20, %v730_v21  ;;  %v1222_v29 = vrot.slane %v1024_v1, %v2521_v43  ;;  %v1226_v19 = vrot.slane %v1024_v1, %v2524_v44 }
  0xfb   : > { %v746_v30 = vcombine.low %v737_v22, %v744_v23  ;;  %v1230_v31 = vrot.slane %v1024_v1, %v2527_v45  ;;  %v1540_v32 = vcombine.low %v1202_v2, %v1206_v17  ;;  %v1541_v34 = vcombine.low %v1210_v24, %v1214_v25 }
  0xfc   : > { %1700 = vperm.xlu0 %2214, %v1539_v27   ;;  %v753_v35 = vrot.slane %v745_v28, %v2530_v47  ;;  %v1542_v37 = vcombine.low %v1218_v26, %v1222_v29  ;;  %v1106_v46 = vrot.slane %v2573_v52, %v2506_v38  ;;  %v1110_v49 = vrot.slane %v2573_v52, %v2509_v39  ;;  %v249_v28 = vpop.xlane.xlu0 %248 }
  0xfd   : > { %v760_v50 = vrot.slane %v746_v30, %v2530_v47  ;;  %v1543_v51 = vcombine.low %v1226_v19, %v1230_v31  ;;  %v1550_v53 = vrot.slane %v1540_v32, %v2530_v47  ;;  %v1557_v54 = vrot.slane %v1541_v34, %v2530_v47 }
  0xfe   : > { %v1564_v55 = vrot.slane %v1542_v37, %v2530_v47  ;;  %v1114_v56 = vrot.slane %v2573_v52, %v2512_v40  ;;  %v1118_v57 = vrot.slane %v2573_v52, %v2515_v41  ;;  %v1122_v58 = vrot.slane %v2573_v52, %v2518_v42 }
  0xff   : > { %v761_v59 = vcombine.low %v753_v35, %v760_v50  ;;  %v1571_v60 = vrot.slane %v1543_v51, %v2530_v47  ;;  %v1572_v61 = vcombine.low %v1550_v53, %v1557_v54  ;;  %v1126_v62 = vrot.slane %v2573_v52, %v2521_v43 }
 0x100   : > { %v1130_v63 = vrot.slane %v2573_v52, %v2524_v44  ;;  %v1134_v0 = vrot.slane %v2573_v52, %v2527_v45  ;;  %v1393_v1 = vcombine.low %v1106_v46, %v1110_v49  ;;  %v1394_v3 = vcombine.low %v1114_v56, %v1118_v57 }
 0x101   : > { %922 = vperm.xlu1 %2215, %v761_v59   ;;  %v1573_v5 = vcombine.low %v1564_v55, %v1571_v60  ;;  %v1580_v6 = vrot.slane %v1572_v61, %v2530_v47  ;;  %v1395_v7 = vcombine.low %v1122_v58, %v1126_v62  ;;  %v1266_v8 = vrot.slane %v1030_v48, %v2506_v38 }
 0x102   : > { %v1396_v9 = vcombine.low %v1130_v63, %v1134_v0  ;;  %v1403_v10 = vrot.slane %v1393_v1, %v2530_v47  ;;  %v1410_v11 = vrot.slane %v1394_v3, %v2530_v47  ;;  %v1270_v12 = vrot.slane %v1030_v48, %v2509_v39  ;;  %v252_v0 = vpop.xlane.xlu0 %251 }
 0x103   : > { %v1587_v13 = vrot.slane %v1573_v5, %v2530_v47  ;;  %v1417_v52 = vrot.slane %v1395_v7, %v2530_v47  ;;  %v1274_v14 = vrot.slane %v1030_v48, %v2512_v40  ;;  %v1278_v15 = vrot.slane %v1030_v48, %v2515_v41 }
 0x104   : > { %v1424_v16 = vrot.slane %v1396_v9, %v2530_v47  ;;  %v1425_v2 = vcombine.low %v1403_v10, %v1410_v11  ;;  %v1282_v17 = vrot.slane %v1030_v48, %v2518_v42  ;;  %v1286_v18 = vrot.slane %v1030_v48, %v2521_v43 }
 0x105   : > { %v1588_v20 = vcombine.low %v1580_v6, %v1587_v13  ;;  %v1290_v21 = vrot.slane %v1030_v48, %v2524_v44  ;;  %v1294_v22 = vrot.slane %v1030_v48, %v2527_v45  ;;  %v1638_v23 = vcombine.low %v1266_v8, %v1270_v12 }
 0x106   : > { %v1426_v24 = vcombine.low %v1417_v52, %v1424_v16  ;;  %v1433_v25 = vrot.slane %v1425_v2, %v2530_v47  ;;  %v1639_v26 = vcombine.low %v1274_v14, %v1278_v15  ;;  %v1640_v27 = vcombine.low %v1282_v17, %v1286_v18 }
 0x107   : > { %1703 = vperm.xlu0 %2214, %v1588_v20   ;;  %v1641_v29 = vcombine.low %v1290_v21, %v1294_v22  ;;  %v1648_v19 = vrot.slane %v1638_v23, %v2530_v47  ;;  %v424_v30 = vrot.slane %v246_v4, %v2506_v38  ;;  %v428_v31 = vrot.slane %v246_v4, %v2509_v39 }
 0x108   : > { %v1440_v32 = vrot.slane %v1426_v24, %v2530_v47  ;;  %v1655_v34 = vrot.slane %v1639_v26, %v2530_v47  ;;  %v1662_v35 = vrot.slane %v1640_v27, %v2530_v47  ;;  %v432_v37 = vrot.slane %v246_v4, %v2512_v40 }
 0x109   : > { %v1669_v46 = vrot.slane %v1641_v29, %v2530_v47  ;;  %v436_v49 = vrot.slane %v246_v4, %v2515_v41  ;;  %v440_v50 = vrot.slane %v246_v4, %v2518_v42  ;;  %v444_v51 = vrot.slane %v246_v4, %v2521_v43 }
 0x10a   : > { %v1441_v53 = vcombine.low %v1433_v25, %v1440_v32  ;;  %v1670_v54 = vcombine.low %v1648_v19, %v1655_v34  ;;  %v448_v48 = vrot.slane %v246_v4, %v2524_v44  ;;  %v452_v55 = vrot.slane %v246_v4, %v2527_v45  ;;  %v1027_v25 = vpop.xlane.xlu0 %1026 }
 0x10b   : > { %v1671_v56 = vcombine.low %v1662_v35, %v1669_v46  ;;  %v762_v57 = vcombine.low %v424_v30, %v428_v31  ;;  %v763_v58 = vcombine.low %v432_v37, %v436_v49  ;;  %v764_v59 = vcombine.low %v440_v50, %v444_v51 }
 0x10c   : > { %1694 = vperm.xlu1 %2215, %v1441_v53   ;;  %v1678_v60 = vrot.slane %v1670_v54, %v2530_v47  ;;  %v765_v61 = vcombine.low %v448_v48, %v452_v55  ;;  %v456_v62 = vrot.slane %v249_v28, %v2506_v38  ;;  %v460_v63 = vrot.slane %v249_v28, %v2509_v39 }
 0x10d   : > { %v1685_v1 = vrot.slane %v1671_v56, %v2530_v47  ;;  %v772_v3 = vrot.slane %v762_v57, %v2530_v47  ;;  %v779_v5 = vrot.slane %v763_v58, %v2530_v47  ;;  %v786_v4 = vrot.slane %v764_v59, %v2530_v47 }
 0x10e   : > { %v793_v6 = vrot.slane %v765_v61, %v2530_v47  ;;  %v464_v7 = vrot.slane %v249_v28, %v2512_v40  ;;  %v468_v8 = vrot.slane %v249_v28, %v2515_v41  ;;  %v472_v9 = vrot.slane %v249_v28, %v2518_v42 }
 0x10f   : > { %v1686_v10 = vcombine.low %v1678_v60, %v1685_v1  ;;  %v794_v11 = vcombine.low %v772_v3, %v779_v5  ;;  %v476_v12 = vrot.slane %v249_v28, %v2521_v43  ;;  %v480_v13 = vrot.slane %v249_v28, %v2524_v44 }
 0x110   : > { %v795_v52 = vcombine.low %v786_v4, %v793_v6  ;;  %v484_v14 = vrot.slane %v249_v28, %v2527_v45  ;;  %v811_v15 = vcombine.low %v456_v62, %v460_v63  ;;  %v812_v16 = vcombine.low %v464_v7, %v468_v8 }
 0x111   : > { %1709 = vperm.xlu0 %2214, %v1686_v10   ;;  %v802_v2 = vrot.slane %v794_v11, %v2530_v47  ;;  %v813_v17 = vcombine.low %v472_v9, %v476_v12  ;;  %v488_v18 = vrot.slane %v252_v0, %v2506_v38  ;;  %v492_v20 = vrot.slane %v252_v0, %v2509_v39 }
 0x112   : > { %v809_v21 = vrot.slane %v795_v52, %v2530_v47  ;;  %v814_v22 = vcombine.low %v480_v13, %v484_v14  ;;  %v821_v23 = vrot.slane %v811_v15, %v2530_v47  ;;  %v828_v24 = vrot.slane %v812_v16, %v2530_v47  ;;  %v1781_v15 = vld [vmem:[%s2917_s1] sm:$0xf] }
 0x113   : > { %v835_v26 = vrot.slane %v813_v17, %v2530_v47  ;;  %v496_v27 = vrot.slane %v252_v0, %v2512_v40  ;;  %v500_v28 = vrot.slane %v252_v0, %v2515_v41  ;;  %v504_v29 = vrot.slane %v252_v0, %v2518_v42  ;;  %v1782_v16 = vld [vmem:[%s2918_s2] sm:$0xff] }
 0x114   : > { %v810_v19 = vcombine.low %v802_v2, %v809_v21  ;;  %v842_v30 = vrot.slane %v814_v22, %v2530_v47  ;;  %v843_v31 = vcombine.low %v821_v23, %v828_v24  ;;  %v508_v32 = vrot.slane %v252_v0, %v2521_v43  ;;  %v1783_v2 = vld [vmem:[%s2918_s2 + $0x8] sm:$0xff]  ;;  %v1784_v21 = vld [vmem:[%s2918_s2 + $0x10] sm:$0xff]  ;;  %v1785_v22 = vld [vmem:[%s2918_s2 + $0x18] sm:$0xff] }
 0x115   : > { %v512_v34 = vrot.slane %v252_v0, %v2524_v44  ;;  %v516_v35 = vrot.slane %v252_v0, %v2527_v45  ;;  %v860_v37 = vcombine.low %v488_v18, %v492_v20  ;;  %v861_v46 = vcombine.low %v496_v27, %v500_v28  ;;  %v1786_v24 = vld [vmem:[%s2918_s2 + $0x20] sm:$0xff]  ;;  %v1788_v27 = vld [vmem:[%s2918_s2 + $0x30] sm:$0xff]  ;;  %v1789_v28 = vld [vmem:[%s2918_s2 + $0x38] sm:$0xff] }
 0x116   : > { %925 = vperm.xlu1 %2215, %v810_v19   ;;  %v844_v49 = vcombine.low %v835_v26, %v842_v30  ;;  %v851_v50 = vrot.slane %v843_v31, %v2530_v47  ;;  %v862_v51 = vcombine.low %v504_v29, %v508_v32  ;;  %v1234_v53 = vrot.slane %v1027_v25, %v2506_v38 }
 0x117   : > { %v863_v54 = vcombine.low %v512_v34, %v516_v35  ;;  %v870_v48 = vrot.slane %v860_v37, %v2530_v47  ;;  %v877_v55 = vrot.slane %v861_v46, %v2530_v47  ;;  %v1238_v56 = vrot.slane %v1027_v25, %v2509_v39 }
 0x118   : > { %v858_v57 = vrot.slane %v844_v49, %v2530_v47  ;;  %v884_v58 = vrot.slane %v862_v51, %v2530_v47  ;;  %v1242_v59 = vrot.slane %v1027_v25, %v2512_v40  ;;  %v1246_v60 = vrot.slane %v1027_v25, %v2515_v41 }
 0x119   : > { %v891_v61 = vrot.slane %v863_v54, %v2530_v47  ;;  %v892_v62 = vcombine.low %v870_v48, %v877_v55  ;;  %v1250_v38 = vrot.slane %v1027_v25, %v2518_v42  ;;  %v1254_v63 = vrot.slane %v1027_v25, %v2521_v43 }
 0x11a   : > { %v859_v0 = vcombine.low %v851_v50, %v858_v57  ;;  %v1258_v1 = vrot.slane %v1027_v25, %v2524_v44  ;;  %v1262_v39 = vrot.slane %v1027_v25, %v2527_v45  ;;  %v1589_v3 = vcombine.low %v1234_v53, %v1238_v56  ;;  %v1787_v25 = vld [vmem:[%s2918_s2 + $0x28] sm:$0xff] }
 0x11b   : > { %v893_v5 = vcombine.low %v884_v58, %v891_v61  ;;  %v900_v4 = vrot.slane %v892_v62, %v2530_v47  ;;  %v1590_v6 = vcombine.low %v1242_v59, %v1246_v60  ;;  %v1591_v40 = vcombine.low %v1250_v38, %v1254_v63 }
 0x11c   : > { %928 = vperm.xlu1 %2215, %v859_v0   ;;  %v1592_v41 = vcombine.low %v1258_v1, %v1262_v39  ;;  %v1599_v7 = vrot.slane %v1589_v3, %v2530_v47  ;;  %v2339_v52 = vmov 0.0   ;;  %v2340_v14 = vmov -inf  }
 0x11d   : > { %v907_v8 = vrot.slane %v893_v5, %v2530_v47  ;;  %v1606_v42 = vrot.slane %v1590_v6, %v2530_v47  ;;  %v1613_v43 = vrot.slane %v1591_v40, %v2530_v47  ;;  %210 = vst.msk [vmem:[#allocation2] sm:$0x1] %vm209_vm0, %v2339_v52  ;;  %2104 = vmatprep.subr.mxu0 %v2339_v52  ;;  %211 = vst.msk [vmem:[#allocation3] sm:$0x1] %vm209_vm0, %v2340_v14  ;;  %v2342_v17 = vmov 0.0|0.0  }
 0x11e   : > { %v1620_v44 = vrot.slane %v1592_v41, %v2530_v47  ;;  %2105 = vmatpush3.xpose.msk.msra.mxu0 %vm1790_vm1, %v1781_v15  ;;  %2106 = vmatprep.mubr.msk.f32.mxu0 %vm2341_vm2, %v2339_v52  ;;  %v2129_v18 = vpack.c.bf16 %v1783_v2, %v1782_v16  ;;  %v2133_v23 = vpack.c.bf16 %v1785_v22, %v1784_v21  ;;  %v934_v46 = vand.u32 127, %v261_v33 }
 0x11f   : > { %v908_v9 = vcombine.low %v900_v4, %v907_v8  ;;  %v1621_v45 = vcombine.low %v1599_v7, %v1606_v42  ;;  %2125 = vmatprep.mubr.msk.f32.mxu1 %vm2341_vm2, %v2339_v52  ;;  %2128 = vmatprep.subr.bf16.mxu1 %v2342_v17  ;;  %v2137_v26 = vpack.c.bf16 %v1787_v25, %v1786_v24 }
 0x120   : > { %v1622_v10 = vcombine.low %v1613_v43, %v1620_v44  ;;  %2131 = vmatpush3.bf16.xpose.msk.msra.mxu1 %vm2800_vm4, %v2129_v18  ;;  %v2141_v29 = vpack.c.bf16 %v1789_v28, %v1788_v27  ;;  %v939_v50 = vadd.s32 4294967288, %v934_v46  ;;  %v946_v51 = vadd.s32 4294967280, %v934_v46 }
 0x121   : > { %931 = vperm.xlu1 %2215, %v908_v9   ;;  %v1629_v11 = vrot.slane %v1621_v45, %v2530_v47  ;;  %2132 = vmatprep.subr.bf16.mxu1 %v2342_v17  ;;  %v953_v54 = vadd.s32 4294967272, %v934_v46  ;;  %v960_v48 = vadd.s32 4294967264, %v934_v46  ;;  %v974_v58 = vadd.s32 4294967248, %v934_v46 }
 0x122   : > { %v1636_v12 = vrot.slane %v1622_v10, %v2530_v47  ;;  %v942_v55 = vsub.s32 %v939_v50, %v2503_v36  ;;  %v949_v57 = vsub.s32 %v946_v51, %v2503_v36  ;;  %v937_v59 = vsub.s32 %v934_v46, %v2503_v36 }
 0x123   : > { %v956_v60 = vsub.s32 %v953_v54, %v2503_v36  ;;  %v967_v61 = vadd.s32 4294967256, %v934_v46  ;;  %v963_v62 = vsub.s32 %v960_v48, %v2503_v36  ;;  %v981_v39 = vadd.s32 4294967240, %v934_v46 }
 0x124   : > { %v1637_v13 = vcombine.low %v1629_v11, %v1636_v12  ;;  %v977_v3 = vsub.s32 %v974_v58, %v2503_v36  ;;  %v228_v25 = vld [vmem:[#allocation2] sm:$0x1] }
 0x125   : > { %v970_v40 = vsub.s32 %v967_v61, %v2503_v36 }
 0x126   : > { %1706 = vperm.xlu1 %2215, %v1637_v13   ;;  %v984_v13 = vsub.s32 %v981_v39, %v2503_v36 }
 0x128   : > { %2135 = vmatpush3.bf16.xpose.msk.msra.mxu1 %vm2800_vm4, %v2133_v23 }
 0x129   : > { %2136 = vmatprep.subr.bf16.mxu1 %v2342_v17 }
 0x130   : > { %2139 = vmatpush3.bf16.xpose.msk.msra.mxu1 %vm2800_vm4, %v2137_v26 }
 0x131   : > { %2140 = vmatprep.subr.bf16.mxu1 %v2342_v17 }
 0x138   : > { %2143 = vmatpush3.bf16.xpose.msk.msra.mxu1 %vm2800_vm4, %v2141_v29 }
 0x157   : > { %v911_v37 = vpop.permute.xlu0 %910 }
 0x158   : > { %v938_v5 = vrot.slane %v911_v37, %v937_v59 }
 0x15d   : > { %v914_v19 = vpop.permute.xlu1 %913 }
 0x15e   : > { %v943_v38 = vrot.slane %v914_v19, %v942_v55 }
 0x160   : > { %v945_v8 = vsel %vm944_vm5, %v943_v38, %v938_v5 }
 0x161   : > { %v917_v30 = vpop.permute.xlu1 %916 }
 0x162   : > { %v950_v0 = vrot.slane %v917_v30, %v949_v57 }
 0x164   : > { %v952_v9 = vsel %vm951_vm6, %v950_v0, %v945_v8 }
 0x166   : > { %v920_v31 = vpop.permute.xlu1 %919 }
 0x167   : > { %v957_v4 = vrot.slane %v920_v31, %v956_v60 }
 0x169   : > { %v959_v12 = vsel %vm958_vm7, %v957_v4, %v952_v9 }
 0x16b   : > { %v1689_v32 = vpop.permute.xlu1 %1688 }
 0x16c   : > { %v1714_v6 = vrot.slane %v1689_v32, %v937_v59 }
 0x171   : > { %v1698_v53 = vpop.permute.xlu0 %1697 }
 0x172   : > { %v1728_v42 = vrot.slane %v1698_v53, %v956_v60 }
 0x176   : > { %v1692_v34 = vpop.permute.xlu1 %1691 }
 0x177   : > { %v1718_v63 = vrot.slane %v1692_v34, %v942_v55  ;;  %v1006_v34 = vld [vmem:[#allocation3] sm:$0x1] }
 0x179   : > { %v1719_v43 = vsel %vm944_vm5, %v1718_v63, %v1714_v6 }
 0x17b   : > { %v1701_v33 = vpop.permute.xlu0 %1700 }
 0x17c   : > { %v1733_v52 = vrot.slane %v1701_v33, %v963_v62 }
 0x180   : > { %v923_v35 = vpop.permute.xlu1 %922 }
 0x181   : > { %v964_v7 = vrot.slane %v923_v35, %v963_v62 }
 0x183   : > { %v966_v14 = vsel %vm965_vm8, %v964_v7, %v959_v12 }
 0x186   : > { %v1704_v45 = vpop.permute.xlu0 %1703 }
 0x187   : > { %v1738_v23 = vrot.slane %v1704_v45, %v970_v40 }
 0x18b   : > { %v1695_v49 = vpop.permute.xlu1 %1694 }
 0x18c   : > { %v1723_v1 = vrot.slane %v1695_v49, %v949_v57 }
 0x18e   : > { %v1724_v10 = vsel %vm951_vm6, %v1723_v1, %v1719_v43 }
 0x18f   : > { %v1729_v16 = vsel %vm958_vm7, %v1728_v42, %v1724_v10 }
 0x190   : > { %v1710_v21 = vpop.permute.xlu0 %1709  ;;  %v1734_v36 = vsel %vm965_vm8, %v1733_v52, %v1729_v16 }
 0x191   : > { %v1748_v28 = vrot.slane %v1710_v21, %v984_v13  ;;  %v1739_v29 = vsel %vm972_vm9, %v1738_v23, %v1734_v36 }
 0x195   : > { %v926_v56 = vpop.permute.xlu1 %925 }
 0x196   : > { %v971_v44 = vrot.slane %v926_v56, %v970_v40 }
 0x198   : > { %v973_v2 = vsel %vm972_vm9, %v971_v44, %v966_v14 }
 0x19b   : > { %v929_v41 = vpop.permute.xlu1 %928 }
 0x19c   : > { %v978_v11 = vrot.slane %v929_v41, %v977_v3 }
 0x19e   : > { %v980_v18 = vsel %vm979_vm10, %v978_v11, %v973_v2 }
 0x1a0   : > { %v932_v15 = vpop.permute.xlu1 %931 }
 0x1a1   : > { %v985_v17 = vrot.slane %v932_v15, %v984_v13 }
 0x1a3   : > { %v987_v20 = vsel %vm986_vm11, %v985_v17, %v980_v18 }
 0x1a4   : > { %v994_v22 = vrot.slane %v987_v20, %v2530_v47 }
 0x1a5   : > { %v1707_v24 = vpop.permute.xlu1 %1706 }
 0x1a6   : > { %v1001_v26 = vrot.slane %v994_v22, %v2530_v47  ;;  %v1743_v27 = vrot.slane %v1707_v24, %v977_v3 }
 0x1a8   : > { %v1744_v19 = vsel %vm979_vm10, %v1743_v27, %v1739_v29  ;;  %v1003_v30 = vadd.f32 %v1001_v26, %v228_v25 }
 0x1a9   : > { %v1749_v31 = vsel %vm986_vm11, %v1748_v28, %v1744_v19 }
 0x1aa   : > { %v1756_v32 = vrot.slane %v1749_v31, %v2530_v47  ;;  %1005 = vst.msk [vmem:[#allocation2] sm:$0x1] %vm209_vm0, %v1003_v30 }
 0x1ac   : > { %v1763_v35 = vrot.slane %v1756_v32, %v2530_v47 }
 0x1ae   : > { %v1765_v37 = vmax.f32 %v1006_v34, %v1763_v35 }
 0x1b0   : > { %1766 = vst.msk [vmem:[#allocation3] sm:$0x1] %vm209_vm0, %v1765_v37 }
 0x1b1   : > { %v1770_v46 = vld [vmem:[#allocation2] sm:$0x1] }
 0x1b2   : > { %v1771_v49 = vmul.f32 0.00390625, %v1770_v46 }
 0x1b7   : > { %v2076_v50 = vld [vmem:[#allocation3] ss:$0 sm:$0xff] }
 0x1b8   : > { %v1780_v51 = vsel %vm1779_vm12, %v1771_v49, %v2076_v50 }
 0x1b9   : > { %2107 = vmatmul.mubr.msk.f32.vlgmr.msra.gmra.mrb[0].mxu0 %vm1790_vm1, %v1780_v51 }
 0x28c   : > { %v1863_v53 = vpop.f32.mrb[0].mxu0 }
 0x28d   : > { %v1867_v54 = vmax.f32 %v1863_v53, 0.0  ;;  %v2108_v48 = vpop.f32.mrb[1].mxu0 }
 0x28f   : > { %2126 = vmatmul.mubr.msk.f32.vlgmr.msra.gmra.mrb[0].mxu1 %vm1868_vm3, %v1867_v54 }
 0x362   : > { %v1962_v55 = vpop.f32.mrb[0].mxu1 }
 0x363   : > { %v1967_v47 = vrot.slane %v1962_v55, 1  ;;  %v2127_v56 = vpop.f32.mrb[1].mxu1 }
 0x365   : > { %v1969_v57 = vadd.f32 %v1967_v47, %v1962_v55 }
 0x367   : > { %v2088_v58 = vmul.f32 -1.442695, %v1969_v57 }
 0x369   : > { %2216 = vpow2.f32 %v2088_v58 }
 0x373   : > { %v2217_v59 = vpop.eup %2216 }
 0x374   : > { %v1973_v60 = vadd.f32 1.0, %v2217_v59 }
 0x376   : > { %2218 = vrcp.f32 %v1973_v60 }
 0x380   : > { %v2219_v61 = vpop.eup %2218 }
 0x381   : > { %1976 = vst.msk [vmem:[%s203_s9] sm:$0x1] %vm209_vm0, %v2219_v61 }
 0x382   : > { %2263 = shalt.err (!%p2260_p5)
}
 0x383   : > { %s2264_s11 = scalar_lea.hbm %s2866_s28, 16  ;;  %s2268_s19 = scalar_lea.hbm %s2919_s3, 32 }
 0x384   : > { %p2265_p4 = scmp.ne.s32.totalorder %s2866_s28, %s2264_s11  ;;  %p2269_p12 = scmp.lt.u32.totalorder %s2866_s28, %s2919_s3 }
 0x385   : > { %p2270_p1 = scmp.lt.u32.totalorder %s2268_s19, %s2264_s11  ;;  %p2272_p8 = scmp.lt.u32.totalorder %s2264_s11, %s2866_s28 }
 0x386   : > { %p2266_p7 = pnand %p2265_p4, %p2929_p9 }
 0x387   : > { %p2271_p3 = por %p2270_p1, %p2269_p12 }
 0x388   : > { %p2267_p10 = pneg %p2266_p7 }
 0x389   : > { %p2273_p11 = por %p2272_p8, %p2271_p3 }
 0x38b   : > { %p2274_p0 = pnand %p2273_p11, %p2267_p10 }
 0x38d   : > { %2277 = shalt.err (!%p2274_p0)
}
 0x38e   : > { %2146 = dma.vmem_to_hbm [thread:$0]  (%p2929_p9), %s2868_s10, 16, %s2866_s28, %s1978_s29  }
 0x38f PF: > { %s2002_s6 = sand.u32 1, %s2312_s12   ;;  %p2930_p6 = scmp.ne.s32.totalorder %s2924_s27, 0 }
 0x390   : > { %p2931_p13 = scmp.ge.s32.totalorder %s2332_s17, 2  ;;  %s2003_s8 = scalar_lea.sflag [#allocation6], %s2002_s6 }
 0x392   : > { %p2153_p2 = pnand %p2931_p13, %p2930_p6 }
 0x394   : > { %2307 = dma.done.wait (!%p2153_p2), %s2003_s8, 16  }
 0x395   : > { %2309 = vsyncadd (!%p2153_p2), %s2003_s8, 4294967280  ;;  %s19_s17 = sadd.s32 1, %s2332_s17   ;;  %s2932_s12 = smov %s2316_s13 }
 0x396   : > { %p16_p5 = scmp.ge.s32.totalorder %s19_s17, 4   ;;  %s2933_s13 = smov %s2320_s14 }
 0x397   : > { %s2934_s14 = smov %s2420_s26  ;;  %s2935_s15 = smov %s2328_s16 }
 0x398   : > { %s2936_s16 = smov %s2938_s20  ;;  %18 = sbr.rel (!%p16_p5) target bundleno = 6 (0x6), region = 85 }
 0x39f   :  { %2007 = vsyncpa [#allocation5], 1 }
 0x3a0   :  { %2009 = vsyncpa [#allocation5 + $0x1], 1 }
 0x3a1   :  { %2010 = vsyncpa [#allocation6], 1 }
 0x3a2   :  { %2012 = vsyncpa [#allocation6 + $0x1], 1 }

</bundles_post_ra>
